<compile_context>
chip_gen: v5e
topology: v5e:2x2
jax: 0.10.0
libtpu: 0.0.40
codegen_flags: <defaults>
</compile_context>

<pallas_src>
import functools
import math
from typing import NamedTuple

import jax
import jax.numpy as jnp
from jax.experimental import pallas as pl
from jax.experimental.pallas import tpu as pltpu


# ---------------------------------------------------------------------------
# Tiling helpers
# ---------------------------------------------------------------------------
def _round_up(x: int, m: int) -> int:
    return (x + m - 1) // m * m


def _sublane(dtype) -> int:
    # Minimum second-to-last tile dim by element width.
    return {4: 8, 2: 16, 1: 32}.get(jnp.dtype(dtype).itemsize, 8)


def _divisor_tile(dim_p: int, max_tile: int, step: int = 128) -> int:
    """Largest multiple of `step` that is <= max_tile and divides dim_p.
    dim_p is assumed to be a multiple of `step`."""
    t = min(dim_p, max_tile)
    t -= t % step
    while t > step:
        if dim_p % t == 0:
            return t
        t -= step
    return step


def _select_tiles(M: int, Kp: int, Np: int, x_dtype):
    """Pick (tm, tn, tk, Mp).  tn | Np and tk | Kp exactly (no over-padding);
    tm keeps the whole (padded) batch resident for small M."""
    sub = _sublane(x_dtype)
    # M tiling: single resident block for M <= 512, balanced ~512 blocks above.
    n_mt = max(1, math.ceil(M / 512))
    tm = _round_up(math.ceil(M / n_mt), sub)
    Mp = tm * n_mt
    # Lane-dense N tiles and large K tiles, but always exact divisors.
    tn = Np if Np <= 640 else _divisor_tile(Np, 512)
    tk = Kp if Kp <= 1024 else _divisor_tile(Kp, 1024)
    # Guarantee >= 2 steps on a 'parallel' axis so v7x's two TensorCores both
    # get work (harmless on 1-TC v5e/v6e).
    if Mp // tm == 1 and Np // tn == 1 and Np >= 256:
        tn = _divisor_tile(Np, Np // 2)
    return tm, tn, tk, Mp


# ---------------------------------------------------------------------------
# Kernels
# ---------------------------------------------------------------------------
def _fc_kernel_f32_out(x_ref, w_ref, b_ref, o_ref, *, apply_relu: bool):
    """f32 output: accumulate directly into the resident output block."""
    k = pl.program_id(2)

    @pl.when(k == 0)
    def _():
        # Seed the accumulator with the bias; epilogue only needs the ReLU.
        o_ref[...] = jnp.broadcast_to(b_ref[...], o_ref.shape)

    o_ref[...] += jnp.dot(x_ref[...].astype(w_ref.dtype), w_ref[...],
                          preferred_element_type=jnp.float32)

    if apply_relu:
        @pl.when(k == pl.num_programs(2) - 1)
        def _():
            o_ref[...] = jnp.maximum(o_ref[...], 0.0)


def _fc_kernel_cast_out(x_ref, w_ref, b_ref, o_ref, acc_ref, *,
                        apply_relu: bool):
    """Non-f32 output: accumulate in an f32 VMEM scratch, cast at the end."""
    k = pl.program_id(2)

    @pl.when(k == 0)
    def _():
        acc_ref[...] = jnp.broadcast_to(b_ref[...], acc_ref.shape)

    acc_ref[...] += jnp.dot(x_ref[...].astype(w_ref.dtype), w_ref[...],
                            preferred_element_type=jnp.float32)

    @pl.when(k == pl.num_programs(2) - 1)
    def _():
        out = acc_ref[...]
        if apply_relu:
            out = jnp.maximum(out, 0.0)
        o_ref[...] = out.astype(o_ref.dtype)


# ---------------------------------------------------------------------------
# Params (padded once, reused across forward calls)
# ---------------------------------------------------------------------------
class FCParams(NamedTuple):
    wp: jax.Array          # (Kp, Np) padded weight (compute dtype)
    bp: jax.Array          # (1, Np)  padded bias (f32)
    in_features: int
    out_features: int


def prepare_fc_params(weight, bias, compute_dtype="auto") -> FCParams:
    """Pad weight/bias to multiples of 128 once (static across forward calls).
    By default f32 weights are stored as bf16 (native MXU dtype, half the HBM
    traffic for this weight-bandwidth-bound layer); accumulation stays f32."""
    K, N = weight.shape
    assert bias.shape == (N,)
    if compute_dtype == "auto":
        compute_dtype = jnp.bfloat16 if weight.dtype == jnp.float32 else None
    if compute_dtype is not None:
        weight = weight.astype(compute_dtype)
    Kp, Np = _round_up(K, 128), _round_up(N, 128)
    if (Kp, Np) == (K, N):
        wp = weight
    else:
        wp = jnp.zeros((Kp, Np), weight.dtype).at[:K, :N].set(weight)
    bp = jnp.zeros((1, Np), jnp.float32).at[0, :N].set(bias.astype(jnp.float32))
    return FCParams(wp, bp, K, N)


# ---------------------------------------------------------------------------
# Forward
# ---------------------------------------------------------------------------
@functools.partial(jax.jit,
                   static_argnames=("in_features", "out_features", "relu"))
def _fc_forward_impl(x, wp, bp, in_features, out_features, relu):
    M, K = x.shape
    assert K == in_features
    Kp, Np = wp.shape
    out_dtype = x.dtype                      # output dtype mimics the input

    tm, tn, tk, Mp = _select_tiles(M, Kp, Np, x.dtype)

    # Only pad x when shapes are not already aligned (skip the HBM pass).
    if (Mp, Kp) == (M, K):
        xp = x
    else:
        xp = jnp.zeros((Mp, Kp), x.dtype).at[:M, :K].set(x)

    grid = (Mp // tm, Np // tn, Kp // tk)

    if jnp.dtype(out_dtype) == jnp.dtype(jnp.float32):
        kernel = functools.partial(_fc_kernel_f32_out, apply_relu=relu)
        scratch = []
    else:
        kernel = functools.partial(_fc_kernel_cast_out, apply_relu=relu)
        scratch = [pltpu.VMEM((tm, tn), jnp.float32)]

    bytes_accessed = (Mp * Kp * jnp.dtype(x.dtype).itemsize
                      + Kp * Np * jnp.dtype(wp.dtype).itemsize
                      + Np * 4
                      + Mp * Np * jnp.dtype(out_dtype).itemsize)

    yp = pl.pallas_call(
        kernel,
        out_shape=jax.ShapeDtypeStruct((Mp, Np), out_dtype),
        grid_spec=pltpu.PrefetchScalarGridSpec(
            num_scalar_prefetch=0,
            grid=grid,
            in_specs=[
                pl.BlockSpec((tm, tk), lambda i, j, k: (i, k)),
                pl.BlockSpec((tk, tn), lambda i, j, k: (k, j)),
                pl.BlockSpec((1, tn), lambda i, j, k: (0, j)),
            ],
            out_specs=pl.BlockSpec((tm, tn), lambda i, j, k: (i, j)),
            scratch_shapes=scratch,
        ),
        compiler_params=pltpu.CompilerParams(
            dimension_semantics=("parallel", "parallel", "arbitrary"),
            vmem_limit_bytes=32 * 1024 * 1024,
        ),
        cost_estimate=pl.CostEstimate(
            flops=2 * Mp * Kp * Np,
            transcendentals=0,
            bytes_accessed=int(bytes_accessed),
        ),
    )(xp, wp, bp)

    # Skip the output slice (extra HBM pass) when already aligned.
    if (Mp, Np) == (M, out_features):
        return yp
    return yp[:M, :out_features]


def fc_forward(x, params: FCParams, relu: bool = True):
    """y = relu(x @ weight + bias) using pre-padded params."""
    return _fc_forward_impl(x, params.wp, params.bp,
                            params.in_features, params.out_features, relu)


def init_fc_params(key, in_features, out_features, dtype=jnp.float32):
    """Deterministic init mimicking nn.Linear's uniform(-1/sqrt(in), 1/sqrt(in)).
    Weight is stored (in_features, out_features) == PyTorch weight.T."""
    kw, kb = jax.random.split(key)
    bound = 1.0 / math.sqrt(in_features)
    weight = jax.random.uniform(kw, (in_features, out_features), dtype,
                                minval=-bound, maxval=bound)
    bias = jax.random.uniform(kb, (out_features,), dtype,
                              minval=-bound, maxval=bound)
    return weight, bias


# ---------------------------------------------------------------------------
# Self-test
# ---------------------------------------------------------------------------
if __name__ == "__main__":
    key = jax.random.PRNGKey(0)
    k_x, k_p, k_x2, k_p2, k_x3, k_p3 = jax.random.split(key, 6)

    # --- Case 1: tiny shapes consistent with the PyTorch module (bf16 path) --
    batch, in_features, out_features = 2, 32, 64
    x = jax.random.normal(k_x, (batch, in_features), jnp.float32)
    weight, bias = init_fc_params(k_p, in_features, out_features)
    params = prepare_fc_params(weight, bias)          # default: bf16 compute

    y = jax.block_until_ready(fc_forward(x, params, relu=True))
    # Reference uses the same bf16-rounded operands, f32 accumulation.
    x_bf = x.astype(jnp.bfloat16).astype(jnp.float32)
    w_bf = weight.astype(jnp.bfloat16).astype(jnp.float32)
    y_ref = jnp.maximum(jnp.dot(x_bf, w_bf,
                                precision=jax.lax.Precision.HIGHEST) + bias, 0.0)
    assert y.shape == (batch, out_features)
    assert jnp.allclose(y, y_ref, atol=1e-3, rtol=1e-3)

    # --- Case 2: multi-tile K/N path, f32 compute, no ReLU --------------------
    batch2, in2, out2 = 4, 2048, 640
    x2 = jax.random.normal(k_x2, (batch2, in2), jnp.float32)
    w2, b2 = init_fc_params(k_p2, in2, out2)
    p2 = prepare_fc_params(w2, b2, compute_dtype=None)    # keep f32 weights

    y2 = jax.block_until_ready(fc_forward(x2, p2, relu=False))
    y2_ref = jnp.dot(x2, w2, precision=jax.lax.Precision.HIGHEST) + b2
    assert y2.shape == (batch2, out2)
    assert jnp.allclose(y2, y2_ref, atol=2e-3, rtol=2e-3)

    # --- Case 3: bf16 in / bf16 out (scratch-accumulator kernel path) --------
    batch3, in3, out3 = 16, 256, 256
    x3 = jax.random.normal(k_x3, (batch3, in3), jnp.bfloat16)
    w3, b3 = init_fc_params(k_p3, in3, out3, dtype=jnp.bfloat16)
    p3 = prepare_fc_params(w3, b3)

    y3 = jax.block_until_ready(fc_forward(x3, p3, relu=True))
    y3_ref = jnp.maximum(
        jnp.dot(x3.astype(jnp.float32), w3.astype(jnp.float32),
                precision=jax.lax.Precision.HIGHEST)
        + b3.astype(jnp.float32), 0.0)
    assert y3.shape == (batch3, out3)
    assert jnp.allclose(y3.astype(jnp.float32), y3_ref, atol=3e-2, rtol=3e-2)

    print("KERNEL_OK")
</pallas_src>

<mosaic_0001>
module attributes {stable_mosaic.version = 11 : i64} {
  func.func @_fc_kernel_f32_out(%arg0: i32, %arg1: i32, %arg2: i32, %arg3: memref<8x128xf32, #tpu.memory_space<vmem>>, %arg4: memref<128x128xbf16, #tpu.memory_space<vmem>>, %arg5: memref<1x128xf32, #tpu.memory_space<vmem>>, %arg6: memref<8x128xf32, #tpu.memory_space<vmem>>) attributes {dimension_semantics = [#tpu.dimension_semantics<parallel>, #tpu.dimension_semantics<parallel>, #tpu.dimension_semantics<arbitrary>], iteration_bounds = array<i64: 1, 1, 1>, scalar_prefetch = 0 : i64, scratch_operands = 0 : i64, tpu.core_type = #tpu.core_type<tc>, window_params = [{transform_indices = @transform_0, window_bounds = array<i64: 8, 128>}, {transform_indices = @transform_1, window_bounds = array<i64: 128, 128>}, {transform_indices = @transform_2, window_bounds = array<i64: 1, 128>}, {transform_indices = @transform_3, window_bounds = array<i64: 8, 128>}]} {
    %c0_i32 = arith.constant 0 : i32
    %0 = arith.cmpi eq, %arg2, %c0_i32 : i32
    %1 = arith.extui %0 : i1 to i32
    %c0_i32_0 = arith.constant 0 : i32
    %2 = arith.cmpi ne, %1, %c0_i32_0 : i32
    scf.if %2 {
      %c0_10 = arith.constant 0 : index
      %c0_11 = arith.constant 0 : index
      %13 = vector.load %arg5[%c0_10, %c0_11] : memref<1x128xf32, #tpu.memory_space<vmem>>, vector<1x128xf32>
      %14 = vector.shape_cast %13 : vector<1x128xf32> to vector<1x128xf32>
      %15 = vector.broadcast %14 : vector<1x128xf32> to vector<8x128xf32>
      %c0_12 = arith.constant 0 : index
      %c0_13 = arith.constant 0 : index
      %16 = vector.load %arg6[%c0_12, %c0_13] : memref<8x128xf32, #tpu.memory_space<vmem>>, vector<8x128xf32>
      tpu.vector_store %arg6[%c0_12, %c0_13], %15 {strides = array<i32>} : memref<8x128xf32, #tpu.memory_space<vmem>>, vector<8x128xf32>,
    } else {
    }
    %c0 = arith.constant 0 : index
    %c0_1 = arith.constant 0 : index
    %3 = vector.load %arg6[%c0, %c0_1] : memref<8x128xf32, #tpu.memory_space<vmem>>, vector<8x128xf32>
    %c0_2 = arith.constant 0 : index
    %c0_3 = arith.constant 0 : index
    %4 = vector.load %arg3[%c0_2, %c0_3] : memref<8x128xf32, #tpu.memory_space<vmem>>, vector<8x128xf32>
    %5 = arith.truncf %4 : vector<8x128xf32> to vector<8x128xbf16>
    %c0_4 = arith.constant 0 : index
    %c0_5 = arith.constant 0 : index
    %6 = vector.load %arg4[%c0_4, %c0_5] : memref<128x128xbf16, #tpu.memory_space<vmem>>, vector<128x128xbf16>
    %cst = arith.constant dense<0.000000e+00> : vector<8x128xf32>
    %7 = tpu.matmul %5, %6, %cst {dimension_numbers = #tpu.dot_dimension_numbers<[1], [0], [0], [1], [0, 0, 1, 1], [], []>} : vector<8x128xbf16>, vector<128x128xbf16>, vector<8x128xf32> -> vector<8x128xf32>
    %8 = arith.addf %3, %7 : vector<8x128xf32>
    %c0_6 = arith.constant 0 : index
    %c0_7 = arith.constant 0 : index
    %9 = vector.load %arg6[%c0_6, %c0_7] : memref<8x128xf32, #tpu.memory_space<vmem>>, vector<8x128xf32>
    tpu.vector_store %arg6[%c0_6, %c0_7], %8 {strides = array<i32>} : memref<8x128xf32, #tpu.memory_space<vmem>>, vector<8x128xf32>,
    %c0_i32_8 = arith.constant 0 : i32
    %10 = arith.cmpi eq, %arg2, %c0_i32_8 : i32
    %11 = arith.extui %10 : i1 to i32
    %c0_i32_9 = arith.constant 0 : i32
    %12 = arith.cmpi ne, %11, %c0_i32_9 : i32
    scf.if %12 {
      %c0_10 = arith.constant 0 : index
      %c0_11 = arith.constant 0 : index
      %13 = vector.load %arg6[%c0_10, %c0_11] : memref<8x128xf32, #tpu.memory_space<vmem>>, vector<8x128xf32>
      %cst_12 = arith.constant 0.000000e+00 : f32
      %14 = vector.broadcast %cst_12 : f32 to vector<8x128xf32>
      %15 = arith.maximumf %13, %14 : vector<8x128xf32>
      %c0_13 = arith.constant 0 : index
      %c0_14 = arith.constant 0 : index
      %16 = vector.load %arg6[%c0_13, %c0_14] : memref<8x128xf32, #tpu.memory_space<vmem>>, vector<8x128xf32>
      tpu.vector_store %arg6[%c0_13, %c0_14], %15 {strides = array<i32>} : memref<8x128xf32, #tpu.memory_space<vmem>>, vector<8x128xf32>,
    } else {
    }
    return
  }
  func.func @transform_0(%arg0: i32, %arg1: i32, %arg2: i32) -> (i32, i32) {
    %c0_i32 = arith.constant 0 : i32
    return %arg0, %arg2 : i32, i32
  }
  func.func @transform_1(%arg0: i32, %arg1: i32, %arg2: i32) -> (i32, i32) {
    %c0_i32 = arith.constant 0 : i32
    return %arg2, %arg1 : i32, i32
  }
  func.func @transform_2(%arg0: i32, %arg1: i32, %arg2: i32) -> (i32, i32) {
    %c0_i32 = arith.constant 0 : i32
    %c0_i32_0 = arith.constant 0 : i32
    return %c0_i32, %arg1 : i32, i32
  }
  func.func @transform_3(%arg0: i32, %arg1: i32, %arg2: i32) -> (i32, i32) {
    %c0_i32 = arith.constant 0 : i32
    return %arg0, %arg1 : i32, i32
  }
}

</mosaic_0001>

<bundles_post_ra>
// kernel: _fc_forward_impl.1
= control target key start
LH: loop header
LB: loop body
LE: loop exit
PB: predicated region body
PF: predicated region fallthrough
CT: control target
= control target key end

     0   :  { %8 = vsyncpa [#allocation3], 0  ;;  %s202_s15 = smov [#allocation2]   ;;  %s203_s17 = smov 64   ;;  %s237_s0 = inlined_call_operand.vmem [shape: f32[8,128], index: 0, kind: input, shape index: {}]   ;;  %s238_s1 = inlined_call_operand.hbm [shape: bf16[128,128], index: 1, kind: input, shape index: {}]   ;;  %s239_s2 = inlined_call_operand.vmem [shape: f32[1,128], index: 2, kind: input, shape index: {}]   ;;  %s240_s3 = inlined_call_operand.vmem [shape: f32[8,128], index: 3, kind: output, shape index: {}]  }
   0x1   :  { %s15_s14 = sshll.u32 %s238_s1, 4  ;;  %s17_s16 = sshll.u32 %s202_s15, 4  ;;  %s16_s14 = int_to_ptr.hbm [resolvable:$true] %s15_s14  ;;  %s18_s16 = int_to_ptr.vmem [resolvable:$true] %s17_s16 }
   0x2   :  { %s204_s18 = smov 4  }
   0x3   :  { %23 = dma.hbm_to_vmem [thread:$0]  %s16_s14, 1024, %s18_s16, [#allocation3], %s203_s17, %s203_s17, %s204_s18  }
   0x4   :  { %200 = dma.done.wait [#allocation3], 1024  }
   0x5   :  { %201 = vsyncadd [#allocation3], 4294966272  ;;  %v171_v0 = vld [vmem:[#allocation2 + $0x38] sm:$0xff]  ;;  %v170_v1 = vld [vmem:[#allocation2 + $0x30] sm:$0xff] }
   0x6   :  { %106 = vmatpush.bf16.msra.mxu0 %v171_v0  ;;  %v169_v2 = vld [vmem:[#allocation2 + $0x28] sm:$0xff]  ;;  %v168_v3 = vld [vmem:[#allocation2 + $0x20] sm:$0xff]  ;;  %v167_v4 = vld [vmem:[#allocation2 + $0x18] sm:$0xff] }
   0x7   :  { %v166_v5 = vld [vmem:[#allocation2 + $0x10] sm:$0xff]  ;;  %v165_v6 = vld [vmem:[#allocation2 + $0x8] sm:$0xff]  ;;  %v164_v7 = vld [vmem:[#allocation2] sm:$0xff] }
   0x8   :  { %v40_v8 = vld [vmem:[%s237_s0] sm:$0xff] }
   0x9   :  { %v41_v9 = vpack.c.bf16 %v40_v8, %v40_v8  ;;  %v175_v10 = vld [vmem:[%s239_s2] ss:$0 sm:$0xff] }
   0xa   :  { %107 = vmatpush.bf16.msra.mxu0 %v170_v1 }
   0xe   :  { %108 = vmatpush.bf16.msra.mxu0 %v169_v2 }
  0x12   :  { %109 = vmatpush.bf16.msra.mxu0 %v168_v3 }
  0x16   :  { %110 = vmatpush.bf16.msra.mxu0 %v167_v4 }
  0x1a   :  { %111 = vmatpush.bf16.msra.mxu0 %v166_v5 }
  0x1e   :  { %112 = vmatpush.bf16.msra.mxu0 %v165_v6 }
  0x22   :  { %113 = vmatpush.bf16.msra.mxu0 %v164_v7 }
  0x25   :  { %114 = vmatmul.bf16.vlgmr.msra.gmra.mxu0 %v41_v9 }
  0xa2   :  { %v115_v11 = vpop.f32.mrf.mxu0 }
  0xa3   :  { %v119_v12 = vadd.f32 %v175_v10, %v115_v11 }
  0xa5   :  { %v125_v13 = vmax.f32 %v119_v12, 0.0 }
  0xa7   :  { %126 = vst [vmem:[%s240_s3] sm:$0xff] %v125_v13 }
  0xaa   :  { %v117_v14 = vpop.f32.mrf.mxu0 }
  0xab   :  { %131 = vsyncpa [#allocation3], 1 }

</bundles_post_ra>
